<compile_context>
chip_gen: v5e
topology: v5e:2x2
jax: 0.10.0
libtpu: 0.0.40
codegen_flags: <defaults>
</compile_context>

<pallas_src>
import functools
from itertools import product

import jax
import jax.numpy as jnp
from jax import lax
from jax.experimental import pallas as pl
from jax.experimental.pallas import tpu as pltpu


def _round_up(n: int, m: int) -> int:
    return ((n + m - 1) // m) * m


def anfis_kernel(xT_ref, mean_ref, nh_ref, bias_ref, csum_ref, out_ref, *, strip):
    """One batch tile, processed in lane strips.

    xT_ref   : (F, TB)   inputs, batch on the lane axis
    mean_ref : (Rp, F)   MF mean gathered per (rule, feature), padded rules
    nh_ref   : (Rp, F)   -0.5 / sigma^2 gathered per (rule, feature)
    bias_ref : (Rp, 1)   0 for real rules, -1e9 for padded rows (log-domain kill)
    csum_ref : (Rp, 1)   consequents.sum(axis=1), 0 for padded rows
    out_ref  : (1, TB)   per-sample output, batch on the lane axis
    """
    mean_e = mean_ref[...]
    nh_e = nh_ref[...]
    bias = bias_ref[...]
    csum = csum_ref[...]

    F = mean_e.shape[1]
    TB = out_ref.shape[1]
    n_strips = TB // strip

    # Loop-invariant (Rp, 1) columns: hoist out of the strip loop.
    mcols = [mean_e[:, f:f + 1] for f in range(F)]
    ncols = [nh_e[:, f:f + 1] for f in range(F)]

    def strip_body(s):
        off = s * strip
        if not isinstance(off, int):
            off = pl.multiple_of(off, strip)

        # Layers 1+2 in log space: acc[r, b] = bias[r] + sum_f nh[r,f]*(x[f,b]-mean[r,f])^2
        acc = None
        for f in range(F):                      # F is small & static -> unrolled
            xr = xT_ref[f:f + 1, pl.ds(off, strip)]     # (1, strip) sublane-bcast row
            d = xr - mcols[f]                            # (Rp, strip)
            t = ncols[f] * (d * d)                       # (Rp, strip)
            acc = (bias + t) if acc is None else (acc + t)

        mi = jnp.exp(acc)                                # single EUP pass per strip

        # Layers 3+4+5 folded:
        #   out[b] = (sum_r mi[r,b]*csum[r]) / (sum_r mi[r,b] + eps)
        w_sum = jnp.sum(mi, axis=0, keepdims=True)       # (1, strip)
        num = jnp.sum(mi * csum, axis=0, keepdims=True)  # (1, strip)
        inv = pl.reciprocal(w_sum + 1e-10, approx=False)
        out_ref[:, pl.ds(off, strip)] = num * inv

    if n_strips == 1:
        strip_body(0)
    else:
        def body(s, carry):
            strip_body(s)
            return carry
        lax.fori_loop(0, n_strips, body, 0, unroll=True)


@functools.partial(jax.jit, static_argnames=("tile_b",))
def anfis_forward(x, means, sigmas, rules, consequents, *, tile_b=1024):
    """ANFIS forward.  x: (B, F); means/sigmas: (F, M); rules: (R, F) int;
    consequents: (R, F+1).  Returns (B,) float32."""
    x = x.astype(jnp.float32)
    B, F = x.shape
    R = rules.shape[0]

    # ---- Host-side precompute (tiny): expand MF parameters per (rule, feature),
    # fold -0.5/sigma^2, fold the consequent sum, pad the rule axis.
    feat_ids = jnp.arange(F, dtype=rules.dtype)[None, :]                 # (1, F)
    mean_exp = means.astype(jnp.float32)[feat_ids, rules]                # (R, F)
    sig_exp = sigmas.astype(jnp.float32)[feat_ids, rules]                # (R, F)
    nh_exp = -0.5 / (sig_exp * sig_exp)                                  # (R, F)
    cons_sum = jnp.sum(consequents.astype(jnp.float32), axis=1,
                       keepdims=True)                                    # (R, 1)

    Rp = _round_up(max(R, 8), 8)
    pad_r = Rp - R
    mean_p = jnp.pad(mean_exp, ((0, pad_r), (0, 0)))                     # (Rp, F)
    nh_p = jnp.pad(nh_exp, ((0, pad_r), (0, 0)))                         # (Rp, F)
    csum_p = jnp.pad(cons_sum, ((0, pad_r), (0, 0)))                     # (Rp, 1)
    # log-domain bias: padded rows get -1e9 -> exp underflows to exactly 0,
    # so they add 0 to both numerator and denominator.
    bias = jnp.pad(jnp.zeros((R, 1), jnp.float32), ((0, pad_r), (0, 0)),
                   constant_values=-1e9)                                 # (Rp, 1)

    # ---- Batch tiling: batch on the lane axis, lane-dense (>=128) tiles,
    # always >=2 grid steps so v7x's 2 TensorCores both get work.
    assert tile_b % 256 == 0 and tile_b >= 256
    tb = min(tile_b, max(256, _round_up(B, 256)))
    Bp = _round_up(B, tb)
    num_tiles = Bp // tb
    if num_tiles == 1:
        tb //= 2                       # split the single tile into two halves
        num_tiles = Bp // tb           # == 2; tb stays a multiple of 128
    strip = 256 if tb % 256 == 0 else 128

    xT = jnp.pad(x, ((0, Bp - B), (0, 0))).T                             # (F, Bp)

    kernel = functools.partial(anfis_kernel, strip=strip)

    cost = pl.CostEstimate(
        flops=int(num_tiles * Rp * tb * (4 * F + 4)),
        transcendentals=int(num_tiles * Rp * tb),
        bytes_accessed=int(4 * (F * Bp + Bp + num_tiles * (2 * Rp * F + 2 * Rp))),
    )

    out = pl.pallas_call(
        kernel,
        out_shape=jax.ShapeDtypeStruct((1, Bp), jnp.float32),
        grid=(num_tiles,),
        in_specs=[
            pl.BlockSpec((F, tb), lambda i: (0, i)),     # x tile, batch on lanes
            pl.BlockSpec((Rp, F), lambda i: (0, 0)),     # broadcast params
            pl.BlockSpec((Rp, F), lambda i: (0, 0)),
            pl.BlockSpec((Rp, 1), lambda i: (0, 0)),
            pl.BlockSpec((Rp, 1), lambda i: (0, 0)),
        ],
        out_specs=pl.BlockSpec((1, tb), lambda i: (0, i)),  # lane-dense output
        compiler_params=pltpu.CompilerParams(
            dimension_semantics=("parallel",),           # megacore / v7x 2-TC
            vmem_limit_bytes=32 * 1024 * 1024,           # fits v5e/v6e/v7x
        ),
        cost_estimate=cost,
    )(xT, mean_p, nh_p, bias, csum_p)
    return out[0, :B]


def anfis_reference(x, means, sigmas, rules, consequents):
    """Pure-JAX reference mirroring the PyTorch forward, for validation."""
    layer_one = jnp.exp(-0.5 * ((x[:, :, None] - means[None]) / sigmas[None]) ** 2)
    B, F = x.shape
    R = rules.shape[0]
    mi = jnp.ones((B, R), jnp.float32)
    for f in range(F):
        mi = mi * layer_one[:, f, rules[:, f]]
    w_sum = jnp.sum(mi, axis=1, keepdims=True) + 1e-10
    normalized = mi / w_sum
    weighted = normalized @ consequents
    return jnp.sum(weighted, axis=1)


if __name__ == "__main__":
    # Small shapes consistent with the module: batch=8, 4 features,
    # 3 membership functions per feature -> 3**4 = 81 rules.
    B, F, M = 8, 4, 3

    key = jax.random.PRNGKey(0)
    kx, kc = jax.random.split(key)

    x = jax.random.normal(kx, (B, F), dtype=jnp.float32)

    # Deterministic Gaussian MF parameters.
    means = jnp.tile(jnp.array([-1.0, 0.0, 1.0], jnp.float32)[None, :], (F, 1))  # (F, M)
    sigmas = jnp.full((F, M), 0.8, dtype=jnp.float32)                            # (F, M)

    # Rule table: cartesian product over MF indices (as in the PyTorch __init__).
    rules = jnp.array(list(product(*[range(M) for _ in range(F)])),
                      dtype=jnp.int32)                                           # (R, F)
    R = rules.shape[0]

    # consequents ~ randn(R, F+1) * 0.01, deterministic.
    consequents = jax.random.normal(kc, (R, F + 1), dtype=jnp.float32) * 0.01

    out = anfis_forward(x, means, sigmas, rules, consequents)
    jax.block_until_ready(out)

    ref = anfis_reference(x, means, sigmas, rules, consequents)
    assert out.shape == (B,)
    assert jnp.allclose(out, ref, atol=1e-5, rtol=1e-5), (out, ref)

    print("KERNEL_OK")
</pallas_src>

<mosaic_0001>
module attributes {stable_mosaic.version = 11 : i64} {
  func.func @anfis_kernel(%arg0: i32, %arg1: memref<4x128xf32, #tpu.memory_space<vmem>>, %arg2: memref<88x4xf32, #tpu.memory_space<vmem>>, %arg3: memref<88x4xf32, #tpu.memory_space<vmem>>, %arg4: memref<88x1xf32, #tpu.memory_space<vmem>>, %arg5: memref<88x1xf32, #tpu.memory_space<vmem>>, %arg6: memref<1x128xf32, #tpu.memory_space<vmem>>) attributes {dimension_semantics = [#tpu.dimension_semantics<parallel>], iteration_bounds = array<i64: 2>, scalar_prefetch = 0 : i64, scratch_operands = 0 : i64, tpu.core_type = #tpu.core_type<tc>, window_params = [{transform_indices = @transform_0, window_bounds = array<i64: 4, 128>}, {pipeline_mode = #tpu.pipeline_mode<synchronous>, transform_indices = @transform_1, window_bounds = array<i64: 88, 4>}, {pipeline_mode = #tpu.pipeline_mode<synchronous>, transform_indices = @transform_2, window_bounds = array<i64: 88, 4>}, {pipeline_mode = #tpu.pipeline_mode<synchronous>, transform_indices = @transform_3, window_bounds = array<i64: 88, 1>}, {pipeline_mode = #tpu.pipeline_mode<synchronous>, transform_indices = @transform_4, window_bounds = array<i64: 88, 1>}, {transform_indices = @transform_5, window_bounds = array<i64: 1, 128>}]} {
    %c0 = arith.constant 0 : index
    %c0_0 = arith.constant 0 : index
    %0 = vector.load %arg2[%c0, %c0_0] : memref<88x4xf32, #tpu.memory_space<vmem>>, vector<88x4xf32>
    %c0_1 = arith.constant 0 : index
    %c0_2 = arith.constant 0 : index
    %1 = vector.load %arg3[%c0_1, %c0_2] : memref<88x4xf32, #tpu.memory_space<vmem>>, vector<88x4xf32>
    %c0_3 = arith.constant 0 : index
    %c0_4 = arith.constant 0 : index
    %2 = vector.load %arg4[%c0_3, %c0_4] : memref<88x1xf32, #tpu.memory_space<vmem>>, vector<88x1xf32>
    %c0_5 = arith.constant 0 : index
    %c0_6 = arith.constant 0 : index
    %3 = vector.load %arg5[%c0_5, %c0_6] : memref<88x1xf32, #tpu.memory_space<vmem>>, vector<88x1xf32>
    %4 = vector.extract_strided_slice %0 {offsets = [0, 0], sizes = [88, 1], strides = [1, 1]} : vector<88x4xf32> to vector<88x1xf32>
    %5 = vector.extract_strided_slice %0 {offsets = [0, 1], sizes = [88, 1], strides = [1, 1]} : vector<88x4xf32> to vector<88x1xf32>
    %6 = vector.extract_strided_slice %0 {offsets = [0, 2], sizes = [88, 1], strides = [1, 1]} : vector<88x4xf32> to vector<88x1xf32>
    %7 = vector.extract_strided_slice %0 {offsets = [0, 3], sizes = [88, 1], strides = [1, 1]} : vector<88x4xf32> to vector<88x1xf32>
    %8 = vector.extract_strided_slice %1 {offsets = [0, 0], sizes = [88, 1], strides = [1, 1]} : vector<88x4xf32> to vector<88x1xf32>
    %9 = vector.extract_strided_slice %1 {offsets = [0, 1], sizes = [88, 1], strides = [1, 1]} : vector<88x4xf32> to vector<88x1xf32>
    %10 = vector.extract_strided_slice %1 {offsets = [0, 2], sizes = [88, 1], strides = [1, 1]} : vector<88x4xf32> to vector<88x1xf32>
    %11 = vector.extract_strided_slice %1 {offsets = [0, 3], sizes = [88, 1], strides = [1, 1]} : vector<88x4xf32> to vector<88x1xf32>
    %c0_7 = arith.constant 0 : index
    %c0_8 = arith.constant 0 : index
    %12 = vector.load %arg1[%c0_7, %c0_8] : memref<4x128xf32, #tpu.memory_space<vmem>>, vector<1x128xf32>
    %13 = vector.broadcast %12 : vector<1x128xf32> to vector<88x128xf32>
    %14 = vector.broadcast %4 : vector<88x1xf32> to vector<88x128xf32>
    %15 = arith.subf %13, %14 : vector<88x128xf32>
    %16 = arith.mulf %15, %15 : vector<88x128xf32>
    %17 = vector.broadcast %8 : vector<88x1xf32> to vector<88x128xf32>
    %18 = arith.mulf %17, %16 : vector<88x128xf32>
    %19 = vector.broadcast %2 : vector<88x1xf32> to vector<88x128xf32>
    %20 = arith.addf %19, %18 : vector<88x128xf32>
    %c1 = arith.constant 1 : index
    %c0_9 = arith.constant 0 : index
    %21 = vector.load %arg1[%c1, %c0_9] : memref<4x128xf32, #tpu.memory_space<vmem>>, vector<1x128xf32>
    %22 = vector.broadcast %21 : vector<1x128xf32> to vector<88x128xf32>
    %23 = vector.broadcast %5 : vector<88x1xf32> to vector<88x128xf32>
    %24 = arith.subf %22, %23 : vector<88x128xf32>
    %25 = arith.mulf %24, %24 : vector<88x128xf32>
    %26 = vector.broadcast %9 : vector<88x1xf32> to vector<88x128xf32>
    %27 = arith.mulf %26, %25 : vector<88x128xf32>
    %28 = arith.addf %20, %27 : vector<88x128xf32>
    %c2 = arith.constant 2 : index
    %c0_10 = arith.constant 0 : index
    %29 = vector.load %arg1[%c2, %c0_10] : memref<4x128xf32, #tpu.memory_space<vmem>>, vector<1x128xf32>
    %30 = vector.broadcast %29 : vector<1x128xf32> to vector<88x128xf32>
    %31 = vector.broadcast %6 : vector<88x1xf32> to vector<88x128xf32>
    %32 = arith.subf %30, %31 : vector<88x128xf32>
    %33 = arith.mulf %32, %32 : vector<88x128xf32>
    %34 = vector.broadcast %10 : vector<88x1xf32> to vector<88x128xf32>
    %35 = arith.mulf %34, %33 : vector<88x128xf32>
    %36 = arith.addf %28, %35 : vector<88x128xf32>
    %c3 = arith.constant 3 : index
    %c0_11 = arith.constant 0 : index
    %37 = vector.load %arg1[%c3, %c0_11] : memref<4x128xf32, #tpu.memory_space<vmem>>, vector<1x128xf32>
    %38 = vector.broadcast %37 : vector<1x128xf32> to vector<88x128xf32>
    %39 = vector.broadcast %7 : vector<88x1xf32> to vector<88x128xf32>
    %40 = arith.subf %38, %39 : vector<88x128xf32>
    %41 = arith.mulf %40, %40 : vector<88x128xf32>
    %42 = vector.broadcast %11 : vector<88x1xf32> to vector<88x128xf32>
    %43 = arith.mulf %42, %41 : vector<88x128xf32>
    %44 = arith.addf %36, %43 : vector<88x128xf32>
    %45 = math.exp %44 : vector<88x128xf32>
    %cst = arith.constant dense<0.000000e+00> : vector<128xf32>
    %46 = vector.multi_reduction <add>, %45, %cst [0] : vector<88x128xf32> to vector<128xf32>
    %47 = vector.shape_cast %46 : vector<128xf32> to vector<1x128xf32>
    %48 = vector.broadcast %3 : vector<88x1xf32> to vector<88x128xf32>
    %49 = arith.mulf %45, %48 : vector<88x128xf32>
    %cst_12 = arith.constant dense<0.000000e+00> : vector<128xf32>
    %50 = vector.multi_reduction <add>, %49, %cst_12 [0] : vector<88x128xf32> to vector<128xf32>
    %51 = vector.shape_cast %50 : vector<128xf32> to vector<1x128xf32>
    %cst_13 = arith.constant 1.000000e-10 : f32
    %52 = vector.broadcast %cst_13 : f32 to vector<1x128xf32>
    %53 = arith.addf %47, %52 : vector<1x128xf32>
    %54 = tpu.reciprocal %53 : vector<1x128xf32> -> vector<1x128xf32>
    %55 = arith.mulf %51, %54 : vector<1x128xf32>
    %c0_14 = arith.constant 0 : index
    %c0_15 = arith.constant 0 : index
    %56 = vector.load %arg6[%c0_14, %c0_15] : memref<1x128xf32, #tpu.memory_space<vmem>>, vector<1x128xf32>
    tpu.vector_store %arg6[%c0_14, %c0_15], %55 {strides = array<i32>} : memref<1x128xf32, #tpu.memory_space<vmem>>, vector<1x128xf32>,
    return
  }
  func.func @transform_0(%arg0: i32) -> (i32, i32) {
    %c0_i32 = arith.constant 0 : i32
    %c0_i32_0 = arith.constant 0 : i32
    return %c0_i32, %arg0 : i32, i32
  }
  func.func @transform_1(%arg0: i32) -> (i32, i32) {
    %c0_i32 = arith.constant 0 : i32
    %c0_i32_0 = arith.constant 0 : i32
    %c0_i32_1 = arith.constant 0 : i32
    return %c0_i32, %c0_i32_0 : i32, i32
  }
  func.func @transform_2(%arg0: i32) -> (i32, i32) {
    %c0_i32 = arith.constant 0 : i32
    %c0_i32_0 = arith.constant 0 : i32
    %c0_i32_1 = arith.constant 0 : i32
    return %c0_i32, %c0_i32_0 : i32, i32
  }
  func.func @transform_3(%arg0: i32) -> (i32, i32) {
    %c0_i32 = arith.constant 0 : i32
    %c0_i32_0 = arith.constant 0 : i32
    %c0_i32_1 = arith.constant 0 : i32
    return %c0_i32, %c0_i32_0 : i32, i32
  }
  func.func @transform_4(%arg0: i32) -> (i32, i32) {
    %c0_i32 = arith.constant 0 : i32
    %c0_i32_0 = arith.constant 0 : i32
    %c0_i32_1 = arith.constant 0 : i32
    return %c0_i32, %c0_i32_0 : i32, i32
  }
  func.func @transform_5(%arg0: i32) -> (i32, i32) {
    %c0_i32 = arith.constant 0 : i32
    %c0_i32_0 = arith.constant 0 : i32
    return %c0_i32, %arg0 : i32, i32
  }
}

</mosaic_0001>

<bundles_post_ra>
// kernel: anfis_forward.1
= control target key start
LH: loop header
LB: loop body
LE: loop exit
PB: predicated region body
PF: predicated region fallthrough
CT: control target
= control target key end

     0   :  { %s1164_s18 = smov 0   ;;  %s1630_s0 = inlined_call_operand.vmem [shape: f32[4,256], index: 0, kind: input, shape index: {}]   ;;  %s1631_s1 = inlined_call_operand.vmem [shape: f32[88,4], index: 1, kind: input, shape index: {}]   ;;  %s1632_s2 = inlined_call_operand.vmem [shape: f32[88,4], index: 2, kind: input, shape index: {}]   ;;  %s1633_s3 = inlined_call_operand.vmem [shape: f32[88,1], index: 3, kind: input, shape index: {}]   ;;  %s1634_s4 = inlined_call_operand.vmem [shape: f32[88,1], index: 4, kind: input, shape index: {}]   ;;  %s1635_s5 = inlined_call_operand.vmem [shape: f32[1,256], index: 5, kind: output, shape index: {}]  }
   0x1 LB: > { %s1059_s19 = sadd.s32 4294967295, %s1128_s18   ;;  %p1063_p0 = scmp.ge.s32.totalorder %s1128_s18, 1  ;;  %s1128_s18 = sphi %s1164_s18, %s15_s18  }
   0x2   : > { %p186_p1 = scmp.lt.s32.totalorder %s1128_s18, 3 }
   0x4   : > { %p187_p2 = pnand %p1063_p0, %p186_p1 }
   0x5   : > { %p211_p3 = scmp.lt.s32.totalorder (!%p187_p2), %s1059_s19, 1 }
   0x6   : > { %190 = sbr.rel (%p187_p2) target bundleno = 450 (0x1c2), region = 40 }
   0xb   : > { %v1175_v0 = vld [vmem:[%s1631_s1 + $0x20] sm:$0xff]  ;;  %v1180_v1 = vld [vmem:[%s1631_s1 + $0x10] sm:$0xff]  ;;  %v1130_v3 = vmov 0   ;;  %s1637_s19 = smov (!%p211_p3, %s1059_s19), 1  ;;  %v1204_v4 = vld [vmem:[%s1631_s1 + $0x28] sm:$0xff]  ;;  %v1131_v34 = vmov 1  }
   0xc   : > { %v1185_v2 = vld [vmem:[%s1631_s1] sm:$0xff]  ;;  %1081 = vset.pattern.permute.xlu2 %v1130_v3  ;;  %1080 = vset.pattern.permute.xlu1 %v1130_v3  ;;  %s1064_s26 = sshll.u32 %s1637_s19, 2  ;;  %v1209_v5 = vld [vmem:[%s1631_s1 + $0x18] sm:$0xff]  ;;  %v1214_v6 = vld [vmem:[%s1631_s1 + $0x8] sm:$0xff]  ;;  %s217_s24 = scalar_lea.vmem %s1635_s5, %s1637_s19 }
   0xd   : > { %1079 = vset.pattern.permute.xlu0 %v1130_v3  ;;  %286 = vperm.xlu2 %1081, %v1175_v0   ;;  %s1199_s29 = scalar_lea.vmem %s1630_s0, %s1064_s26  ;;  %v1222_v7 = vld [vmem:[%s1631_s1 + $0x40] sm:$0xff]  ;;  %v1227_v8 = vld [vmem:[%s1631_s1 + $0x38] sm:$0xff]  ;;  %v1232_v9 = vld [vmem:[%s1631_s1 + $0x30] sm:$0xff] }
   0xe   : > { %276 = vperm.xlu1 %1080, %v1180_v1   ;;  %266 = vperm.xlu0 %1079, %v1185_v2   ;;  %v1240_v10 = vld [vmem:[%s1632_s2] sm:$0xff]  ;;  %v1245_v11 = vld [vmem:[%s1631_s1 + $0x50] sm:$0xff]  ;;  %v1250_v12 = vld [vmem:[%s1631_s1 + $0x48] sm:$0xff] }
   0xf   : > { %v1258_v13 = vld [vmem:[%s1632_s2 + $0x18] sm:$0xff]  ;;  %v1263_v14 = vld [vmem:[%s1632_s2 + $0x10] sm:$0xff]  ;;  %v1268_v15 = vld [vmem:[%s1632_s2 + $0x8] sm:$0xff] }
  0x10   : > { %v1276_v16 = vld [vmem:[%s1632_s2 + $0x30] sm:$0xff]  ;;  %v1281_v17 = vld [vmem:[%s1632_s2 + $0x28] sm:$0xff]  ;;  %v1286_v18 = vld [vmem:[%s1632_s2 + $0x20] sm:$0xff] }
  0x11   : > { %v1294_v19 = vld [vmem:[%s1632_s2 + $0x48] sm:$0xff]  ;;  %v1299_v20 = vld [vmem:[%s1632_s2 + $0x40] sm:$0xff]  ;;  %v1304_v21 = vld [vmem:[%s1632_s2 + $0x38] sm:$0xff] }
  0x12   : > { %v241_v22 = vld [vmem:[%s1633_s3 + $0x8] sm:$0xff]  ;;  %v240_v23 = vld [vmem:[%s1633_s3] sm:$0xff]  ;;  %v1318_v24 = vld [vmem:[%s1632_s2 + $0x50] sm:$0xff] }
  0x13   : > { %v244_v25 = vld [vmem:[%s1633_s3 + $0x20] sm:$0xff]  ;;  %v243_v26 = vld [vmem:[%s1633_s3 + $0x18] sm:$0xff]  ;;  %v242_v27 = vld [vmem:[%s1633_s3 + $0x10] sm:$0xff] }
  0x14   : > { %v247_v28 = vld [vmem:[%s1633_s3 + $0x38] sm:$0xff]  ;;  %v246_v29 = vld [vmem:[%s1633_s3 + $0x30] sm:$0xff]  ;;  %v245_v30 = vld [vmem:[%s1633_s3 + $0x28] sm:$0xff] }
  0x15   : > { %291 = vperm.xlu2 %1081, %v1204_v4   ;;  %v250_v31 = vld [vmem:[%s1633_s3 + $0x50] sm:$0xff]  ;;  %v249_v32 = vld [vmem:[%s1633_s3 + $0x48] sm:$0xff]  ;;  %v248_v33 = vld [vmem:[%s1633_s3 + $0x40] sm:$0xff] }
  0x16   : > { %281 = vperm.xlu1 %1080, %v1209_v5   ;;  %271 = vperm.xlu0 %1079, %v1214_v6   ;;  %v1360_v38 = vld [vmem:[%s1199_s29] ss:$0 sm:$0xff] }
  0x1d   : > { %306 = vperm.xlu2 %1081, %v1222_v7  }
  0x1e   : > { %301 = vperm.xlu1 %1080, %v1227_v8   ;;  %296 = vperm.xlu0 %1079, %v1232_v9  }
  0x25   : > { %343 = vperm.xlu2 %1081, %v1240_v10  }
  0x26   : > { %316 = vperm.xlu1 %1080, %v1245_v11   ;;  %311 = vperm.xlu0 %1079, %v1250_v12  }
  0x2d   : > { %358 = vperm.xlu2 %1081, %v1258_v13  }
  0x2e   : > { %353 = vperm.xlu1 %1080, %v1263_v14   ;;  %348 = vperm.xlu0 %1079, %v1268_v15  }
  0x35   : > { %373 = vperm.xlu2 %1081, %v1276_v16  }
  0x36   : > { %368 = vperm.xlu1 %1080, %v1281_v17   ;;  %363 = vperm.xlu0 %1079, %v1286_v18  }
  0x3d   : > { %388 = vperm.xlu2 %1081, %v1294_v19  }
  0x3e   : > { %383 = vperm.xlu1 %1080, %v1299_v20   ;;  %378 = vperm.xlu0 %1079, %v1304_v21  }
  0x45   : > { %414 = vperm.xlu2 %1081, %v241_v22  }
  0x46   : > { %409 = vperm.xlu1 %1080, %v240_v23   ;;  %393 = vperm.xlu0 %1079, %v1318_v24  }
  0x4d   : > { %429 = vperm.xlu2 %1081, %v244_v25  }
  0x4e   : > { %424 = vperm.xlu1 %1080, %v243_v26   ;;  %419 = vperm.xlu0 %1079, %v242_v27   ;;  %v1132_v26 = vmov 2  }
  0x55   : > { %444 = vperm.xlu2 %1081, %v247_v28  }
  0x56   : > { %439 = vperm.xlu1 %1080, %v246_v29   ;;  %434 = vperm.xlu0 %1079, %v245_v30  }
  0x5d   : > { %459 = vperm.xlu2 %1081, %v250_v31  }
  0x5e   : > { %454 = vperm.xlu1 %1080, %v249_v32   ;;  %449 = vperm.xlu0 %1079, %v248_v33  }
  0x65   : > { %1084 = vset.pattern.permute.xlu2 %v1131_v34 }
  0x66   : > { %1083 = vset.pattern.permute.xlu1 %v1131_v34  ;;  %1082 = vset.pattern.permute.xlu0 %v1131_v34 }
  0x67   : > { %484 = vperm.xlu2 %1084, %v1180_v1   ;;  %480 = vperm.xlu1 %1083, %v1214_v6   ;;  %v287_v35 = vpop.permute.xlu2 %286 }
  0x68   : > { %476 = vperm.xlu0 %1082, %v1185_v2   ;;  %v323_v32 = vsub.f32 %v1360_v38, %v287_v35 }
  0x6f   : > { %492 = vperm.xlu2 %1084, %v1175_v0   ;;  %488 = vperm.xlu1 %1083, %v1209_v5   ;;  %v292_v36 = vpop.permute.xlu2 %291 }
  0x70   : > { %496 = vperm.xlu0 %1082, %v1204_v4   ;;  %v324_v33 = vsub.f32 %v1360_v38, %v292_v36 }
  0x77   : > { %504 = vperm.xlu2 %1084, %v1227_v8   ;;  %500 = vperm.xlu1 %1083, %v1232_v9   ;;  %v1356_v37 = vpop.permute.xlu2 %306 }
  0x78   : > { %508 = vperm.xlu0 %1082, %v1222_v7   ;;  %v327_v35 = vsub.f32 %v1360_v38, %v1356_v37 }
  0x7f   : > { %516 = vperm.xlu2 %1084, %v1245_v11   ;;  %512 = vperm.xlu1 %1083, %v1250_v12   ;;  %v344_v39 = vpop.permute.xlu2 %343 }
  0x80   : > { %542 = vperm.xlu0 %1082, %v1240_v10   ;;  %v277_v40 = vpop.permute.xlu1 %276  ;;  %v267_v41 = vpop.permute.xlu0 %266 }
  0x81   : > { %v319_v42 = vsub.f32 %v1360_v38, %v267_v41  ;;  %v321_v61 = vsub.f32 %v1360_v38, %v277_v40  ;;  %v335_v40 = vmul.f32 %v324_v33, %v324_v33 }
  0x83   : > { %v330_v43 = vmul.f32 %v319_v42, %v319_v42  ;;  %v332_v23 = vmul.f32 %v321_v61, %v321_v61 }
  0x85   : > { %v1366_v44 = vmul.f32 %v344_v39, %v330_v43  ;;  %v334_v39 = vmul.f32 %v323_v32, %v323_v32 }
  0x87   : > { %550 = vperm.xlu2 %1084, %v1263_v14   ;;  %546 = vperm.xlu1 %1083, %v1268_v15   ;;  %v359_v45 = vpop.permute.xlu2 %358 }
  0x88   : > { %554 = vperm.xlu0 %1082, %v1258_v13   ;;  %v282_v46 = vpop.permute.xlu1 %281  ;;  %v272_v47 = vpop.permute.xlu0 %271 }
  0x89   : > { %v322_v48 = vsub.f32 %v1360_v38, %v282_v46  ;;  %v320_v62 = vsub.f32 %v1360_v38, %v272_v47 }
  0x8b   : > { %v333_v49 = vmul.f32 %v322_v48, %v322_v48  ;;  %v331_v25 = vmul.f32 %v320_v62, %v320_v62  ;;  %v338_v48 = vmul.f32 %v327_v35, %v327_v35 }
  0x8d   : > { %v1372_v50 = vmul.f32 %v359_v45, %v333_v49 }
  0x8f   : > { %562 = vperm.xlu2 %1084, %v1281_v17   ;;  %558 = vperm.xlu1 %1083, %v1286_v18   ;;  %v374_v51 = vpop.permute.xlu2 %373 }
  0x90   : > { %566 = vperm.xlu0 %1082, %v1276_v16   ;;  %v302_v52 = vpop.permute.xlu1 %301  ;;  %v297_v53 = vpop.permute.xlu0 %296 }
  0x91   : > { %v325_v54 = vsub.f32 %v1360_v38, %v297_v53  ;;  %v326_v36 = vsub.f32 %v1360_v38, %v302_v52 }
  0x93   : > { %v336_v55 = vmul.f32 %v325_v54, %v325_v54  ;;  %v337_v49 = vmul.f32 %v326_v36, %v326_v36 }
  0x95   : > { %v1378_v56 = vmul.f32 %v374_v51, %v336_v55 }
  0x97   : > { %574 = vperm.xlu2 %1084, %v1299_v20   ;;  %570 = vperm.xlu1 %1083, %v1304_v21   ;;  %v389_v57 = vpop.permute.xlu2 %388 }
  0x98   : > { %578 = vperm.xlu0 %1082, %v1294_v19   ;;  %v317_v58 = vpop.permute.xlu1 %316  ;;  %v312_v59 = vpop.permute.xlu0 %311 }
  0x99   : > { %v328_v60 = vsub.f32 %v1360_v38, %v312_v59  ;;  %v329_v59 = vsub.f32 %v1360_v38, %v317_v58 }
  0x9b   : > { %v339_v63 = vmul.f32 %v328_v60, %v328_v60  ;;  %v340_v52 = vmul.f32 %v329_v59, %v329_v59 }
  0x9d   : > { %v1386_v22 = vmul.f32 %v389_v57, %v339_v63 }
  0x9f   : > { %1085 = vset.pattern.permute.xlu2 %v1132_v26  ;;  %582 = vperm.xlu1 %1083, %v1318_v24   ;;  %v415_v27 = vpop.permute.xlu2 %414 }
  0xa0   : > { %1086 = vset.pattern.permute.xlu0 %v1132_v26  ;;  %v354_v28 = vpop.permute.xlu1 %353  ;;  %610 = vperm.xlu2 %1085, %v1185_v2   ;;  %v349_v29 = vpop.permute.xlu0 %348 }
  0xa1   : > { %v398_v30 = vmul.f32 %v354_v28, %v332_v23  ;;  %614 = vperm.xlu0 %1086, %v1214_v6   ;;  %v397_v31 = vmul.f32 %v349_v29, %v331_v25 }
  0xa3   : > { %v1393_v34 = vadd.f32 %v415_v27, %v397_v31 }
  0xa7   : > { %1087 = vset.pattern.permute.xlu1 %v1132_v26  ;;  %v430_v41 = vpop.permute.xlu2 %429 }
  0xa8   : > { %v369_v42 = vpop.permute.xlu1 %368  ;;  %618 = vperm.xlu1 %1087, %v1180_v1   ;;  %622 = vperm.xlu2 %1085, %v1209_v5   ;;  %v364_v43 = vpop.permute.xlu0 %363 }
  0xa9   : > { %v401_v45 = vmul.f32 %v369_v42, %v335_v40  ;;  %634 = vperm.xlu0 %1086, %v1232_v9   ;;  %v400_v46 = vmul.f32 %v364_v43, %v334_v39 }
  0xab   : > { %v1401_v47 = vadd.f32 %v430_v41, %v400_v46  ;;  %v1133_v41 = vmov 3  }
  0xaf   : > { %v445_v51 = vpop.permute.xlu2 %444 }
  0xb0   : > { %v384_v53 = vpop.permute.xlu1 %383  ;;  %626 = vperm.xlu1 %1087, %v1175_v0   ;;  %630 = vperm.xlu2 %1085, %v1204_v4   ;;  %v379_v54 = vpop.permute.xlu0 %378 }
  0xb1   : > { %v404_v55 = vmul.f32 %v384_v53, %v338_v48  ;;  %646 = vperm.xlu0 %1086, %v1250_v12   ;;  %v403_v57 = vmul.f32 %v379_v54, %v337_v49 }
  0xb3   : > { %v1407_v37 = vadd.f32 %v445_v51, %v403_v57 }
  0xb7   : > { %v460_v60 = vpop.permute.xlu2 %459 }
  0xb8   : > { %v410_v61 = vpop.permute.xlu1 %409  ;;  %638 = vperm.xlu1 %1087, %v1227_v8   ;;  %642 = vperm.xlu2 %1085, %v1222_v7   ;;  %v394_v62 = vpop.permute.xlu0 %393 }
  0xb9   : > { %v1412_v63 = vadd.f32 %v410_v61, %v1366_v44  ;;  %680 = vperm.xlu0 %1086, %v1268_v15   ;;  %v406_v23 = vmul.f32 %v394_v62, %v340_v52 }
  0xbb   : > { %v1415_v25 = vadd.f32 %v460_v60, %v406_v23 }
  0xc0   : > { %v425_v26 = vpop.permute.xlu1 %424  ;;  %650 = vperm.xlu1 %1087, %v1245_v11   ;;  %676 = vperm.xlu2 %1085, %v1240_v10   ;;  %v420_v38 = vpop.permute.xlu0 %419 }
  0xc1   : > { %v1420_v58 = vadd.f32 %v425_v26, %v1372_v50  ;;  %692 = vperm.xlu0 %1086, %v1286_v18   ;;  %v464_v27 = vadd.f32 %v420_v38, %v398_v30  ;;  %v485_v28 = vpop.permute.xlu2 %484 }
  0xc8   : > { %v440_v44 = vpop.permute.xlu1 %439  ;;  %684 = vperm.xlu1 %1087, %v1263_v14   ;;  %688 = vperm.xlu2 %1085, %v1258_v13   ;;  %v435_v29 = vpop.permute.xlu0 %434 }
  0xc9   : > { %v1426_v31 = vadd.f32 %v440_v44, %v1378_v56  ;;  %704 = vperm.xlu0 %1086, %v1304_v21   ;;  %v467_v32 = vadd.f32 %v435_v29, %v401_v45  ;;  %v1429_v33 = vpop.permute.xlu2 %492  ;;  %v1444_v45 = vld [vmem:[%s1199_s29 + $0x1] ss:$0 sm:$0xff] }
  0xca   : > { %v521_v46 = vsub.f32 %v1444_v45, %v485_v28 }
  0xcc   : > { %v532_v35 = vmul.f32 %v521_v46, %v521_v46 }
  0xd0   : > { %v455_v50 = vpop.permute.xlu1 %454  ;;  %696 = vperm.xlu1 %1087, %v1281_v17   ;;  %700 = vperm.xlu2 %1085, %v1276_v16   ;;  %v450_v30 = vpop.permute.xlu0 %449 }
  0xd1   : > { %v1434_v39 = vadd.f32 %v455_v50, %v1386_v22  ;;  %716 = vperm.xlu0 %1086, %v1318_v24   ;;  %v470_v40 = vadd.f32 %v450_v30, %v404_v55  ;;  %v1437_v56 = vpop.permute.xlu2 %504  ;;  %v523_v30 = vsub.f32 %v1444_v45, %v1429_v33 }
  0xd8   : > { %708 = vperm.xlu1 %1087, %v1299_v20   ;;  %712 = vperm.xlu2 %1085, %v1294_v19  }
  0xd9   : > { %1090 = vset.pattern.permute.xlu0 %v1133_v41  ;;  %v1441_v42 = vpop.permute.xlu2 %516  ;;  %v481_v43 = vpop.permute.xlu1 %480 }
  0xda   : > { %752 = vperm.xlu0 %1090, %v1180_v1   ;;  %v477_v22 = vpop.permute.xlu0 %476  ;;  %v520_v26 = vsub.f32 %v1444_v45, %v481_v43 }
  0xdc   : > { %v531_v44 = vmul.f32 %v520_v26, %v520_v26 }
  0xe0   : > { %1088 = vset.pattern.permute.xlu1 %v1133_v41  ;;  %1089 = vset.pattern.permute.xlu2 %v1133_v41 }
  0xe1   : > { %v551_v36 = vpop.permute.xlu2 %550  ;;  %v489_v48 = vpop.permute.xlu1 %488  ;;  %744 = vperm.xlu1 %1088, %v1185_v2   ;;  %748 = vperm.xlu2 %1089, %v1214_v6   ;;  %v519_v6 = vsub.f32 %v1444_v45, %v477_v22 }
  0xe2   : > { %v587_v49 = vmul.f32 %v551_v36, %v532_v35  ;;  %772 = vperm.xlu0 %1090, %v1227_v8   ;;  %v497_v51 = vpop.permute.xlu0 %496 }
  0xe3   : > { %v524_v53 = vsub.f32 %v1444_v45, %v497_v51  ;;  %v530_v61 = vmul.f32 %v519_v6, %v519_v6  ;;  %v529_v51 = vsub.f32 %v1444_v45, %v1441_v42 }
  0xe4   : > { %v1452_v54 = vadd.f32 %v587_v49, %v464_v27  ;;  %v522_v27 = vsub.f32 %v1444_v45, %v489_v48 }
  0xe5   : > { %v535_v1 = vmul.f32 %v524_v53, %v524_v53 }
  0xe6   : > { %v533_v29 = vmul.f32 %v522_v27, %v522_v27 }
  0xe9   : > { %v563_v55 = vpop.permute.xlu2 %562  ;;  %v501_v57 = vpop.permute.xlu1 %500  ;;  %756 = vperm.xlu1 %1088, %v1209_v5   ;;  %760 = vperm.xlu2 %1089, %v1175_v0  }
  0xea   : > { %v590_v59 = vmul.f32 %v563_v55, %v535_v1  ;;  %784 = vperm.xlu0 %1090, %v1245_v11   ;;  %v509_v2 = vpop.permute.xlu0 %508  ;;  %v1515_v55 = vld [vmem:[%s1199_s29 + $0x2] ss:$0 sm:$0xff] }
  0xeb   : > { %v527_v8 = vsub.f32 %v1444_v45, %v509_v2  ;;  %v259_v2 = vld [vmem:[%s1634_s4 + $0x40] sm:$0xff] }
  0xec   : > { %v1459_v52 = vadd.f32 %v590_v59, %v467_v32 }
  0xed   : > { %v538_v60 = vmul.f32 %v527_v8, %v527_v8 }
  0xf1   : > { %v575_v62 = vpop.permute.xlu2 %574  ;;  %v513_v23 = vpop.permute.xlu1 %512  ;;  %764 = vperm.xlu1 %1088, %v1204_v4   ;;  %768 = vperm.xlu2 %1089, %v1232_v9  }
  0xf2   : > { %v593_v5 = vmul.f32 %v575_v62, %v538_v60  ;;  %818 = vperm.xlu0 %1090, %v1263_v14   ;;  %v543_v0 = vpop.permute.xlu0 %542  ;;  %v252_v62 = vld [vmem:[%s1634_s4 + $0x8] sm:$0xff] }
  0xf3   : > { %v585_v11 = vmul.f32 %v543_v0, %v530_v61 }
  0xf4   : > { %v1465_v38 = vadd.f32 %v593_v5, %v470_v40 }
  0xf5   : > { %v1469_v28 = vadd.f32 %v585_v11, %v1412_v63  ;;  %v525_v63 = vsub.f32 %v1444_v45, %v501_v57 }
  0xf7   : > { %v536_v43 = vmul.f32 %v525_v63, %v525_v63 }
  0xf9   : > { %v547_v32 = vpop.permute.xlu1 %546  ;;  %776 = vperm.xlu1 %1088, %v1222_v7   ;;  %780 = vperm.xlu2 %1089, %v1250_v12   ;;  %v534_v7 = vmul.f32 %v523_v30, %v523_v30 }
  0xfa   : > { %v586_v4 = vmul.f32 %v547_v32, %v531_v44  ;;  %830 = vperm.xlu0 %1090, %v1281_v17   ;;  %v555_v9 = vpop.permute.xlu0 %554  ;;  %v611_v14 = vpop.permute.xlu2 %610 }
  0xfb   : > { %v588_v50 = vmul.f32 %v555_v9, %v533_v29  ;;  %v254_v29 = vld [vmem:[%s1634_s4 + $0x18] sm:$0xff] }
  0xfc   : > { %v1477_v40 = vadd.f32 %v586_v4, %v1393_v34  ;;  %v526_v34 = vsub.f32 %v1444_v45, %v1437_v56 }
  0xfd   : > { %v1481_v41 = vadd.f32 %v588_v50, %v1420_v58  ;;  %v528_v58 = vsub.f32 %v1444_v45, %v513_v23  ;;  %v653_v45 = vsub.f32 %v1515_v55, %v611_v14 }
  0xff   : > { %v664_v6 = vmul.f32 %v653_v45, %v653_v45 }
 0x101   : > { %v559_v12 = vpop.permute.xlu1 %558  ;;  %810 = vperm.xlu1 %1088, %v1240_v10   ;;  %814 = vperm.xlu2 %1089, %v1268_v15   ;;  %v537_v10 = vmul.f32 %v526_v34, %v526_v34  ;;  %v251_v15 = vld [vmem:[%s1634_s4] sm:$0xff] }
 0x102   : > { %v589_v17 = vmul.f32 %v559_v12, %v534_v7  ;;  %842 = vperm.xlu0 %1090, %v1299_v20   ;;  %v567_v22 = vpop.permute.xlu0 %566  ;;  %v623_v33 = vpop.permute.xlu2 %622  ;;  %v539_v20 = vmul.f32 %v528_v58, %v528_v58  ;;  %v257_v12 = vld [vmem:[%s1634_s4 + $0x30] sm:$0xff] }
 0x103   : > { %v591_v46 = vmul.f32 %v567_v22, %v536_v43  ;;  %v656_v61 = vsub.f32 %v1515_v55, %v623_v33 }
 0x104   : > { %v1489_v35 = vadd.f32 %v589_v17, %v1401_v47  ;;  %v258_v17 = vld [vmem:[%s1634_s4 + $0x38] sm:$0xff] }
 0x105   : > { %v1493_v36 = vadd.f32 %v591_v46, %v1426_v31  ;;  %v667_v23 = vmul.f32 %v656_v61, %v656_v61 }
 0x109   : > { %v571_v48 = vpop.permute.xlu1 %570  ;;  %822 = vperm.xlu1 %1088, %v1258_v13   ;;  %826 = vperm.xlu2 %1089, %v1286_v18   ;;  %v540_v13 = vmul.f32 %v529_v51, %v529_v51  ;;  %v256_v18 = vld [vmem:[%s1634_s4 + $0x28] sm:$0xff] }
 0x10a   : > { %v592_v56 = vmul.f32 %v571_v48, %v537_v10  ;;  %1091 = vset.pattern.permute.xlu0 %v1130_v3  ;;  %v579_v47 = vpop.permute.xlu0 %578  ;;  %v1501_v49 = vpop.permute.xlu2 %630 }
 0x10b   : > { %v594_v31 = vmul.f32 %v579_v47, %v539_v20  ;;  %915 = vperm.xlu0 %1091, %v251_v15   ;;  %v261_v47 = vld [vmem:[%s1634_s4 + $0x50] sm:$0xff] }
 0x10c   : > { %v1506_v53 = vadd.f32 %v592_v56, %v1407_v37  ;;  %v260_v56 = vld [vmem:[%s1634_s4 + $0x48] sm:$0xff] }
 0x10d   : > { %v1509_v1 = vadd.f32 %v594_v31, %v1434_v39 }
 0x111   : > { %v583_v57 = vpop.permute.xlu1 %582  ;;  %834 = vperm.xlu1 %1088, %v1276_v16   ;;  %838 = vperm.xlu2 %1089, %v1304_v21  }
 0x112   : > { %v595_v59 = vmul.f32 %v583_v57, %v540_v13  ;;  %v1519_v42 = vpop.permute.xlu2 %642 }
 0x113   : > { %940 = vperm.xlu0 %1091, %v256_v18   ;;  %v615_v37 = vpop.permute.xlu0 %614 }
 0x114   : > { %v1522_v39 = vadd.f32 %v595_v59, %v1415_v25  ;;  %v654_v27 = vsub.f32 %v1515_v55, %v615_v37 }
 0x116   : > { %v665_v32 = vmul.f32 %v654_v27, %v654_v27 }
 0x119   : > { %846 = vperm.xlu1 %1088, %v1294_v19   ;;  %850 = vperm.xlu2 %1089, %v1318_v24   ;;  %v253_v19 = vld [vmem:[%s1634_s4 + $0x10] sm:$0xff] }
 0x11a   : > { %v619_v16 = vpop.permute.xlu1 %618  ;;  %v677_v21 = vpop.permute.xlu2 %676 }
 0x11b   : > { %v719_v8 = vmul.f32 %v677_v21, %v664_v6  ;;  %955 = vperm.xlu0 %1091, %v259_v2   ;;  %v635_v60 = vpop.permute.xlu0 %634 }
 0x11c   : > { %v659_v0 = vsub.f32 %v1515_v55, %v635_v60 }
 0x11d   : > { %v1532_v25 = vadd.f32 %v719_v8, %v1469_v28 }
 0x11e   : > { %v670_v44 = vmul.f32 %v659_v0, %v659_v0 }
 0x121   : > { %1092 = vset.pattern.permute.xlu1 %v1130_v3  ;;  %1093 = vset.pattern.permute.xlu2 %v1130_v3  ;;  %v255_v3 = vld [vmem:[%s1634_s4 + $0x20] sm:$0xff] }
 0x122   : > { %v627_v24 = vpop.permute.xlu1 %626  ;;  %920 = vperm.xlu1 %1092, %v252_v62   ;;  %925 = vperm.xlu2 %1093, %v253_v19   ;;  %v689_v5 = vpop.permute.xlu2 %688  ;;  %v661_v62 = vsub.f32 %v1515_v55, %v1519_v42 }
 0x123   : > { %v722_v11 = vmul.f32 %v689_v5, %v667_v23  ;;  %v647_v26 = vpop.permute.xlu0 %646  ;;  %v657_v7 = vsub.f32 %v1515_v55, %v627_v24 }
 0x124   : > { %v662_v63 = vsub.f32 %v1515_v55, %v647_v26  ;;  %v672_v23 = vmul.f32 %v661_v62, %v661_v62 }
 0x125   : > { %v1545_v28 = vadd.f32 %v722_v11, %v1481_v41  ;;  %v668_v33 = vmul.f32 %v657_v7, %v657_v7 }
 0x126   : > { %v673_v22 = vmul.f32 %v662_v63, %v662_v63 }
 0x12a   : > { %v639_v4 = vpop.permute.xlu1 %638  ;;  %930 = vperm.xlu1 %1092, %v254_v29   ;;  %935 = vperm.xlu2 %1093, %v255_v3   ;;  %v701_v9 = vpop.permute.xlu2 %700 }
 0x12b   : > { %v725_v14 = vmul.f32 %v701_v9, %v670_v44  ;;  %v681_v50 = vpop.permute.xlu0 %680  ;;  %v660_v20 = vsub.f32 %v1515_v55, %v639_v4 }
 0x12c   : > { %v720_v30 = vmul.f32 %v681_v50, %v665_v32 }
 0x12d   : > { %v1555_v41 = vadd.f32 %v725_v14, %v1493_v36  ;;  %v671_v51 = vmul.f32 %v660_v20, %v660_v20 }
 0x12e   : > { %v1559_v43 = vadd.f32 %v720_v30, %v1477_v40  ;;  %v655_v40 = vsub.f32 %v1515_v55, %v619_v16 }
 0x130   : > { %v666_v31 = vmul.f32 %v655_v40, %v655_v40 }
 0x132   : > { %v651_v46 = vpop.permute.xlu1 %650  ;;  %945 = vperm.xlu1 %1092, %v257_v12   ;;  %950 = vperm.xlu2 %1093, %v258_v17   ;;  %v713_v34 = vpop.permute.xlu2 %712 }
 0x133   : > { %v728_v58 = vmul.f32 %v713_v34, %v673_v22  ;;  %v693_v36 = vpop.permute.xlu0 %692  ;;  %v663_v37 = vsub.f32 %v1515_v55, %v651_v46 }
 0x134   : > { %v723_v10 = vmul.f32 %v693_v36, %v668_v33 }
 0x135   : > { %v1569_v15 = vadd.f32 %v728_v58, %v1509_v1  ;;  %v674_v16 = vmul.f32 %v663_v37, %v663_v37 }
 0x136   : > { %v1573_v48 = vadd.f32 %v723_v10, %v1489_v35  ;;  %v658_v35 = vsub.f32 %v1515_v55, %v1501_v49 }
 0x138   : > { %v669_v6 = vmul.f32 %v658_v35, %v658_v35 }
 0x13a   : > { %v685_v13 = vpop.permute.xlu1 %684  ;;  %960 = vperm.xlu1 %1092, %v260_v56   ;;  %965 = vperm.xlu2 %1093, %v261_v47  }
 0x13b   : > { %v721_v1 = vmul.f32 %v685_v13, %v666_v31  ;;  %v705_v18 = vpop.permute.xlu0 %704  ;;  %v749_v2 = vpop.permute.xlu2 %748 }
 0x13c   : > { %v726_v57 = vmul.f32 %v705_v18, %v671_v51 }
 0x13d   : > { %v732_v59 = vadd.f32 %v721_v1, %v1452_v54 }
 0x13e   : > { %v1586_v45 = vadd.f32 %v726_v57, %v1506_v53 }
 0x142   : > { %v697_v21 = vpop.permute.xlu1 %696 }
 0x143   : > { %v724_v8 = vmul.f32 %v697_v21, %v669_v6  ;;  %v717_v60 = vpop.permute.xlu0 %716  ;;  %v761_v19 = vpop.permute.xlu2 %760 }
 0x144   : > { %v729_v61 = vmul.f32 %v717_v60, %v674_v16 }
 0x145   : > { %v735_v49 = vadd.f32 %v724_v8, %v1459_v52  ;;  %v1600_v52 = vld [vmem:[%s1199_s29 + $0x3] ss:$0 sm:$0xff] }
 0x146   : > { %v1592_v54 = vadd.f32 %v729_v61, %v1522_v39  ;;  %v788_v3 = vsub.f32 %v1600_v52, %v749_v2  ;;  %v791_v17 = vsub.f32 %v1600_v52, %v761_v19 }
 0x148   : > { %v799_v4 = vmul.f32 %v788_v3, %v788_v3  ;;  %v802_v40 = vmul.f32 %v791_v17, %v791_v17 }
 0x14a   : > { %v709_v53 = vpop.permute.xlu1 %708 }
 0x14b   : > { %v727_v24 = vmul.f32 %v709_v53, %v672_v23  ;;  %v769_v11 = vpop.permute.xlu2 %768 }
 0x14c   : > { %v753_v0 = vpop.permute.xlu0 %752 }
 0x14d   : > { %v1595_v5 = vadd.f32 %v727_v24, %v1465_v38  ;;  %v789_v32 = vsub.f32 %v1600_v52, %v753_v0 }
 0x14f   : > { %v800_v14 = vmul.f32 %v789_v32, %v789_v32 }
 0x153   : > { %v745_v26 = vpop.permute.xlu1 %744  ;;  %v1597_v29 = vpop.permute.xlu2 %780 }
 0x154   : > { %v773_v27 = vpop.permute.xlu0 %772  ;;  %v787_v30 = vsub.f32 %v1600_v52, %v745_v26  ;;  %v796_v3 = vsub.f32 %v1600_v52, %v1597_v29 }
 0x156   : > { %v798_v22 = vmul.f32 %v787_v30, %v787_v30 }
 0x15b   : > { %v757_v44 = vpop.permute.xlu1 %756  ;;  %v815_v39 = vpop.permute.xlu2 %814 }
 0x15c   : > { %v785_v55 = vpop.permute.xlu0 %784  ;;  %v854_v50 = vmul.f32 %v815_v39, %v799_v4  ;;  %v790_v20 = vsub.f32 %v1600_v52, %v757_v44 }
 0x15d   : > { %v797_v26 = vsub.f32 %v1600_v52, %v785_v55 }
 0x15e   : > { %v865_v12 = vadd.f32 %v854_v50, %v1559_v43  ;;  %v794_v43 = vsub.f32 %v1600_v52, %v773_v27  ;;  %v801_v1 = vmul.f32 %v790_v20, %v790_v20 }
 0x15f   : > { %v808_v32 = vmul.f32 %v797_v26, %v797_v26 }
 0x160   : > { %v877_v36 = vmul.f32 1.442695, %v865_v12  ;;  %v805_v6 = vmul.f32 %v794_v43, %v794_v43 }
 0x162   : > { %1098 = vpow2.f32 %v877_v36 }
 0x163   : > { %v765_v42 = vpop.permute.xlu1 %764  ;;  %v827_v63 = vpop.permute.xlu2 %826 }
 0x164   : > { %v819_v9 = vpop.permute.xlu0 %818  ;;  %v792_v46 = vsub.f32 %v1600_v52, %v765_v42  ;;  %v857_v31 = vmul.f32 %v827_v63, %v802_v40 }
 0x165   : > { %v855_v7 = vmul.f32 %v819_v9, %v800_v14 }
 0x166   : > { %v803_v47 = vmul.f32 %v792_v46, %v792_v46 }
 0x167   : > { %v866_v34 = vadd.f32 %v855_v7, %v732_v59  ;;  %v868_v59 = vadd.f32 %v857_v31, %v1573_v48  ;;  %v807_v7 = vmul.f32 %v796_v3, %v796_v3 }
 0x168   : > { %v1099_v8 = vpop.eup %1098 }
 0x169   : > { %v879_v51 = vmul.f32 1.442695, %v866_v34  ;;  %v883_v62 = vmul.f32 1.442695, %v868_v59 }
 0x16b   : > { %v777_v38 = vpop.permute.xlu1 %776  ;;  %v839_v18 = vpop.permute.xlu2 %838 }
 0x16c   : > { %v831_v10 = vpop.permute.xlu0 %830  ;;  %v795_v37 = vsub.f32 %v1600_v52, %v777_v38  ;;  %v860_v23 = vmul.f32 %v839_v18, %v805_v6 }
 0x16d   : > { %v858_v57 = vmul.f32 %v831_v10, %v803_v47 }
 0x16e   : > { %v806_v19 = vmul.f32 %v795_v37, %v795_v37 }
 0x16f   : > { %v869_v16 = vadd.f32 %v858_v57, %v735_v49 }
 0x171   : > { %v885_v27 = vmul.f32 1.442695, %v869_v16 }
 0x173   : > { %v811_v33 = vpop.permute.xlu1 %810  ;;  %v851_v49 = vpop.permute.xlu2 %850 }
 0x174   : > { %v853_v58 = vmul.f32 %v811_v33, %v798_v22  ;;  %v843_v60 = vpop.permute.xlu0 %842  ;;  %v863_v14 = vmul.f32 %v851_v49, %v808_v32 }
 0x175   : > { %v861_v44 = vmul.f32 %v843_v60, %v806_v19 }
 0x176   : > { %v864_v56 = vadd.f32 %v853_v58, %v1532_v25  ;;  %v793_v25 = vsub.f32 %v1600_v52, %v769_v11  ;;  %v874_v29 = vadd.f32 %v863_v14, %v1592_v54 }
 0x177   : > { %v872_v4 = vadd.f32 %v861_v44, %v1595_v5 }
 0x178   : > { %v875_v13 = vmul.f32 1.442695, %v864_v56  ;;  %v804_v24 = vmul.f32 %v793_v25, %v793_v25  ;;  %v895_v34 = vmul.f32 1.442695, %v874_v29 }
 0x179   : > { %v891_v12 = vmul.f32 1.442695, %v872_v4 }
 0x17a   : > { %1100 = vpow2.f32 %v875_v13 }
 0x17b   : > { %v823_v35 = vpop.permute.xlu1 %822  ;;  %1102 = vpow2.f32 %v879_v51 }
 0x17c   : > { %v856_v2 = vmul.f32 %v823_v35, %v801_v1  ;;  %v926_v5 = vpop.permute.xlu2 %925 }
 0x17d   : > { %v916_v40 = vpop.permute.xlu0 %915 }
 0x17e   : > { %v867_v21 = vadd.f32 %v856_v2, %v1545_v28  ;;  %v871_v28 = vadd.f32 %v860_v23, %v1586_v45 }
 0x180   : > { %v1101_v61 = vpop.eup %1100  ;;  %v881_v53 = vmul.f32 1.442695, %v867_v21  ;;  %v889_v38 = vmul.f32 1.442695, %v871_v28 }
 0x181   : > { %v897_v0 = vadd.f32 %v1101_v61, %v1099_v8  ;;  %v1103_v48 = vpop.eup %1102  ;;  %v968_v31 = vmul.f32 %v1101_v61, %v916_v40 }
 0x182   : > { %1104 = vpow2.f32 %v881_v53  ;;  %v970_v13 = vmul.f32 %v1103_v48, %v926_v5 }
 0x183   : > { %v898_v11 = vadd.f32 %v1103_v48, %v897_v0  ;;  %v835_v42 = vpop.permute.xlu1 %834  ;;  %1106 = vpow2.f32 %v883_v62 }
 0x184   : > { %v859_v39 = vmul.f32 %v835_v42, %v804_v24  ;;  %1108 = vpow2.f32 %v885_v27  ;;  %v936_v18 = vpop.permute.xlu2 %935 }
 0x185   : > { %v941_v37 = vpop.permute.xlu0 %940 }
 0x186   : > { %v870_v9 = vadd.f32 %v859_v39, %v1555_v41 }
 0x188   : > { %v1105_v55 = vpop.eup %1104  ;;  %v887_v50 = vmul.f32 1.442695, %v870_v9 }
 0x189   : > { %v899_v30 = vadd.f32 %v1105_v55, %v898_v11  ;;  %v1107_v63 = vpop.eup %1106 }
 0x18a   : > { %1110 = vpow2.f32 %v887_v50  ;;  %v1109_v22 = vpop.eup %1108  ;;  %v972_v16 = vmul.f32 %v1107_v63, %v936_v18 }
 0x18b   : > { %v900_v45 = vadd.f32 %v1107_v63, %v899_v30  ;;  %v847_v17 = vpop.permute.xlu1 %846  ;;  %1112 = vpow2.f32 %v889_v38  ;;  %v973_v62 = vmul.f32 %v1109_v22, %v941_v37 }
 0x18c   : > { %v862_v52 = vmul.f32 %v847_v17, %v807_v7  ;;  %1114 = vpow2.f32 %v891_v12  ;;  %v951_v23 = vpop.permute.xlu2 %950 }
 0x18d   : > { %v901_v33 = vadd.f32 %v1109_v22, %v900_v45  ;;  %v956_v26 = vpop.permute.xlu0 %955 }
 0x18e   : > { %v873_v41 = vadd.f32 %v862_v52, %v1569_v15 }
 0x190   : > { %v1111_v46 = vpop.eup %1110  ;;  %v893_v58 = vmul.f32 1.442695, %v873_v41 }
 0x191   : > { %v902_v36 = vadd.f32 %v1111_v46, %v901_v33  ;;  %v1113_v10 = vpop.eup %1112 }
 0x192   : > { %1116 = vpow2.f32 %v893_v58  ;;  %v1115_v56 = vpop.eup %1114  ;;  %v975_v44 = vmul.f32 %v1113_v10, %v951_v23 }
 0x193   : > { %v903_v20 = vadd.f32 %v1113_v10, %v902_v36  ;;  %1118 = vpow2.f32 %v895_v34  ;;  %v976_v28 = vmul.f32 %v1115_v56, %v956_v26 }
 0x194   : > { %v921_v47 = vpop.permute.xlu1 %920  ;;  %v966_v3 = vpop.permute.xlu2 %965 }
 0x195   : > { %v904_v51 = vadd.f32 %v1115_v56, %v903_v20  ;;  %v969_v54 = vmul.f32 %v1099_v8, %v921_v47 }
 0x197   : > { %v979_v43 = vadd.f32 %v969_v54, %v968_v31 }
 0x198   : > { %v1117_v1 = vpop.eup %1116 }
 0x199   : > { %v905_v57 = vadd.f32 %v1117_v1, %v904_v51  ;;  %v980_v15 = vadd.f32 %v979_v43, %v970_v13  ;;  %v1119_v35 = vpop.eup %1118 }
 0x19a   : > { %v978_v9 = vmul.f32 %v1119_v35, %v966_v3 }
 0x19b   : > { %v906_v59 = vadd.f32 %v1119_v35, %v905_v57 }
 0x19c   : > { %v931_v2 = vpop.permute.xlu1 %930 }
 0x19d   : > { %v907_v25 = vrot.slane %v906_v59, 4  ;;  %v971_v6 = vmul.f32 %v1105_v55, %v931_v2 }
 0x19f   : > { %v908_v21 = vadd.f32 %v907_v25, %v906_v59  ;;  %v981_v60 = vadd.f32 %v980_v15, %v971_v6 }
 0x1a1   : > { %v909_v19 = vrot.slane %v908_v21, 2  ;;  %v982_v61 = vadd.f32 %v981_v60, %v972_v16 }
 0x1a3   : > { %v910_v8 = vadd.f32 %v909_v19, %v908_v21  ;;  %v983_v53 = vadd.f32 %v982_v61, %v973_v62 }
 0x1a4   : > { %v946_v24 = vpop.permute.xlu1 %945 }
 0x1a5   : > { %v911_v0 = vrot.slane %v910_v8, 1  ;;  %v974_v48 = vmul.f32 %v1111_v46, %v946_v24 }
 0x1a7   : > { %v912_v27 = vadd.f32 %v911_v0, %v910_v8  ;;  %v984_v11 = vadd.f32 %v983_v53, %v974_v48 }
 0x1a9   : > { %v995_v42 = vadd.f32 1e-10, %v912_v27  ;;  %v985_v49 = vadd.f32 %v984_v11, %v975_v44 }
 0x1ab   : > { %1120 = vrcp.f32 %v995_v42  ;;  %v986_v39 = vadd.f32 %v985_v49, %v976_v28  ;;  %v1007_v22 = vand.u32 2147483648, %v995_v42  ;;  %vm1001_vm1 = vweird.f32 %v995_v42 }
 0x1ac   : > { %v961_v32 = vpop.permute.xlu1 %960  ;;  %v1005_v52 = vand.u32 2147483647, %v995_v42 }
 0x1ad   : > { %v977_v4 = vmul.f32 %v1117_v1, %v961_v32  ;;  %v1008_v41 = vor.u32 1.1754944e-38, %v1007_v22 }
 0x1ae   : > { %vm1006_vm3 = vcmp.eq.f32.partialorder %v1005_v52, 8.507059e+37 }
 0x1af   : > { %v987_v55 = vadd.f32 %v986_v39, %v977_v4 }
 0x1b1   : > { %v1121_v38 = vpop.eup %1120  ;;  %v988_v14 = vadd.f32 %v987_v55, %v978_v9 }
 0x1b2   : > { %v997_v50 = vmul.f32 %v1121_v38, %v995_v42  ;;  %vm1002_vm0 = vweird.f32 %v1121_v38 }
 0x1b3   : > { %v989_v30 = vrot.slane %v988_v14, 4  ;;  %vm1003_vm2 = vmor %vm1001_vm1, %vm1002_vm0 }
 0x1b4   : > { %v998_v63 = vsub.f32 1.0, %v997_v50 }
 0x1b5   : > { %v990_v7 = vadd.f32 %v989_v30, %v988_v14 }
 0x1b6   : > { %v999_v12 = vmul.f32 %v1121_v38, %v998_v63 }
 0x1b7   : > { %v991_v45 = vrot.slane %v990_v7, 2 }
 0x1b8   : > { %v1000_v17 = vadd.f32 %v1121_v38, %v999_v12 }
 0x1b9   : > { %v992_v29 = vadd.f32 %v991_v45, %v990_v7 }
 0x1ba   : > { %v1004_v5 = vsel %vm1003_vm2, %v1121_v38, %v1000_v17 }
 0x1bb   : > { %v993_v33 = vrot.slane %v992_v29, 1  ;;  %v1009_v34 = vsel %vm1006_vm3, %v1008_v41, %v1004_v5 }
 0x1bd   : > { %v994_v46 = vadd.f32 %v993_v33, %v992_v29 }
 0x1bf   : > { %v1010_v58 = vmul.f32 %v1009_v34, %v994_v46 }
 0x1c1   : > { %1011 = vst [vmem:[%s217_s24] sm:$0x1] %v1010_v58 }
 0x1c2 PF: > { %s15_s18 = sadd.s32 1, %s1128_s18  }
 0x1c3   : > { %p12_p4 = scmp.ge.s32.totalorder %s15_s18, 4  }
 0x1c5   :  { %14 = sbr.rel (!%p12_p4) target bundleno = 1 (0x1), region = 70 }

</bundles_post_ra>
